<compile_context>
chip_gen: v5e
topology: v5e:2x2
jax: 0.10.0
libtpu: 0.0.40
codegen_flags: <defaults>
</compile_context>

<pallas_src>
import jax
import jax.numpy as jnp
from jax.experimental import pallas as pl
from jax.experimental.pallas import tpu as pltpu


def _relation_network_kernel(x_ref, w1_ref, b1_ref, w2_ref, b2_ref, o_ref):
    # NOTE: rows are fully independent (per-row softmax).  This is what makes an
    # unpadded cdiv batch grid safe: garbage rows in a partial last x tile only
    # produce garbage output rows, which are masked on store.  Do NOT add any
    # reduction across the batch (sublane) axis without re-adding masking.

    # fc1: cast the streamed f32 x tile to bf16 on the VPU (hidden under the
    # DMA/MXU), accumulate in f32 on the MXU; bias + ReLU stay in f32
    # (v5e has no bf16 VPU/EUP path).
    x = x_ref[...].astype(jnp.bfloat16)
    h = jnp.dot(x, w1_ref[...], preferred_element_type=jnp.float32)
    h = jnp.maximum(h + b1_ref[...], 0.0)                       # (TB, H) + (1, H)

    # fc2: bf16 MXU operands, f32 accumulation.
    logits = jnp.dot(h.astype(jnp.bfloat16), w2_ref[...],
                     preferred_element_type=jnp.float32)
    logits = logits + b2_ref[...]                               # (TB, O) + (1, O)

    # softmax over dim=1 (the feature axis of the 2-D input), entirely in f32.
    m = jnp.max(logits, axis=-1, keepdims=True)
    e = jnp.exp(logits - m)
    denom = jnp.sum(e, axis=-1, keepdims=True)
    # approx=False: exact normalization (rows sum to 1 to f32 precision); the
    # divide is essentially free here.
    o_ref[...] = (e * pl.reciprocal(denom, approx=False)).astype(o_ref.dtype)


def _round_up(v, m):
    return ((v + m - 1) // m) * m


def prepare_relation_params(w1, b1, w2, b2):
    """One-time parameter preprocessing (hoisted out of the per-call path).

    Weights are (in_features, out_features), i.e. transposed vs. nn.Linear, so
    the kernel computes x @ W + b.  MXU operands are bf16; biases stay f32
    because the whole epilogue runs in f32.
    """
    H = w1.shape[1]
    O = w2.shape[1]
    return (jnp.asarray(w1, jnp.bfloat16),
            jnp.asarray(b1, jnp.float32).reshape(1, H),
            jnp.asarray(w2, jnp.bfloat16),
            jnp.asarray(b2, jnp.float32).reshape(1, O))


def _vmem_limit_bytes(TB, IN, H, O):
    x_bufs = 2 * TB * IN * 4                               # streamed f32 x, 2 bufs
    out_bufs = 2 * TB * O * 4                              # streamed f32 out, 2 bufs
    w_bufs = IN * H * 2 + H * 4 + H * O * 2 + O * 4        # resident weights/biases
    interm = TB * IN * 2 + TB * H * 6 + TB * O * 8         # x_bf16, h(f32+bf16), logits+e
    need = x_bufs + out_bufs + 2 * w_bufs + interm         # 2*w: safe if double-buffered
    # 2x headroom; clamp to [16 MiB, 48 MiB] so the limit is valid on v7x
    # (64 MiB physical VMEM) as well as v5e/v6e (128 MiB).
    return int(min(48 * 1024 * 1024, max(16 * 1024 * 1024, 2 * need)))


def relation_network(x, params, *, block_b=1024, single_buffer_weights=True):
    """softmax(relu(x @ w1 + b1) @ w2 + b2, axis=1) — RelationNetwork.forward.

    x      : (B, IN) f32
    params : output of prepare_relation_params(w1, b1, w2, b2)
    Returns  (B, O) f32.
    """
    w1_bf, b1, w2_bf, b2 = params
    B, IN = x.shape
    H = w1_bf.shape[1]
    O = w2_bf.shape[1]

    # Batch tile: multiple of 16 (bf16 sublane packing), large enough to
    # amortize per-grid-step overhead, but capped so the batch grid keeps >= 4
    # tiles when possible — the single "parallel" axis is what shards work
    # across v7x's two TensorCores.
    TB = min(block_b, max(16, _round_up(pl.cdiv(B, 4), 16)))
    TB = max(16, (TB // 16) * 16)
    grid = (pl.cdiv(B, TB),)          # no materialized batch padding

    out_shape = jax.ShapeDtypeStruct((B, O), jnp.float32)
    compiler_params = pltpu.CompilerParams(
        dimension_semantics=("parallel",),
        vmem_limit_bytes=_vmem_limit_bytes(TB, IN, H, O),
    )

    def make_call(weight_mode):
        def resident(shape):
            return pl.BlockSpec(shape, lambda i: (0, 0), pipeline_mode=weight_mode)

        return pl.pallas_call(
            _relation_network_kernel,
            out_shape=out_shape,
            grid_spec=pltpu.PrefetchScalarGridSpec(
                num_scalar_prefetch=0,
                grid=grid,
                in_specs=[
                    # x tile streamed from HBM as f32 (bf16 cast happens
                    # in-kernel).  If a trace ever shows the tiny per-tile DMA
                    # exposed, sweep pipeline_mode=pl.Buffered(3) here.
                    pl.BlockSpec((TB, IN), lambda i: (i, 0)),
                    resident((IN, H)),     # w1  (VMEM-resident)
                    resident((1, H)),      # b1
                    resident((H, O)),      # w2
                    resident((1, O)),      # b2
                ],
                # Unpadded lane width: O << 128 means a masked vst in VMEM, but
                # HBM writeback is only the useful bytes and no trailing slice.
                out_specs=pl.BlockSpec((TB, O), lambda i: (i, 0)),
            ),
            compiler_params=compiler_params,
        )

    if single_buffer_weights:
        try:
            # Constant index_map => never re-DMA'd; single-buffer to halve the
            # resident-weight VMEM footprint (matters on v7x / large H).
            return make_call(pl.Buffered(buffer_count=1))(x, w1_bf, b1, w2_bf, b2)
        except Exception:
            pass  # this jax version rejects buffer_count=1; use default buffering
    return make_call(None)(x, w1_bf, b1, w2_bf, b2)


def reference(x, w1, b1, w2, b2):
    h = jnp.maximum(x @ w1 + b1, 0.0)
    return jax.nn.softmax(h @ w2 + b2, axis=1)


if __name__ == "__main__":
    # Small shapes consistent with the module: batch=32, input_size=32,
    # hidden_size=32, output_size=16.  block_b=16 -> a 2-tile batch grid, which
    # exercises the streamed-x / resident-weights pipeline.
    B, IN, H, O = 32, 32, 32, 16

    key = jax.random.PRNGKey(0)
    kx, k1, kb1, k2, kb2 = jax.random.split(key, 5)

    x = jax.random.normal(kx, (B, IN), dtype=jnp.float32)
    # PyTorch nn.Linear-style uniform init, bound 1/sqrt(fan_in); weights kept
    # as (in, out) so the kernel computes x @ W + b.
    w1 = jax.random.uniform(k1, (IN, H), jnp.float32, -1.0, 1.0) / jnp.sqrt(IN)
    b1 = jax.random.uniform(kb1, (H,), jnp.float32, -1.0, 1.0) / jnp.sqrt(IN)
    w2 = jax.random.uniform(k2, (H, O), jnp.float32, -1.0, 1.0) / jnp.sqrt(H)
    b2 = jax.random.uniform(kb2, (O,), jnp.float32, -1.0, 1.0) / jnp.sqrt(H)

    params = prepare_relation_params(w1, b1, w2, b2)   # one-time, not per call
    out = relation_network(x, params, block_b=16)
    out = jax.block_until_ready(out)

    ref = reference(x, w1, b1.reshape(1, H), w2, b2.reshape(1, O))
    assert out.shape == (B, O), out.shape
    # bf16 MXU inputs -> ~1e-2 absolute error on probabilities vs f32 reference.
    max_err = float(jnp.max(jnp.abs(out - ref)))
    assert max_err < 2e-2, f"mismatch vs f32 reference: max abs err {max_err}"
    # Exact (non-approx) normalization: rows sum to 1 to f32 precision.
    assert jnp.allclose(jnp.sum(out, axis=1), 1.0, atol=1e-3)

    print("KERNEL_OK")
</pallas_src>

<mosaic_0001>
module attributes {stable_mosaic.version = 11 : i64} {
  func.func @_relation_network_kernel(%arg0: i32, %arg1: memref<16x32xf32, #tpu.memory_space<vmem>>, %arg2: memref<32x32xbf16, #tpu.memory_space<vmem>>, %arg3: memref<1x32xf32, #tpu.memory_space<vmem>>, %arg4: memref<32x16xbf16, #tpu.memory_space<vmem>>, %arg5: memref<1x16xf32, #tpu.memory_space<vmem>>, %arg6: memref<16x16xf32, #tpu.memory_space<vmem>>) attributes {dimension_semantics = [#tpu.dimension_semantics<parallel>], iteration_bounds = array<i64: 2>, scalar_prefetch = 0 : i64, scratch_operands = 0 : i64, tpu.core_type = #tpu.core_type<tc>, window_params = [{transform_indices = @transform_0, window_bounds = array<i64: 16, 32>}, {pipeline_mode = #tpu.pipeline_mode<synchronous>, transform_indices = @transform_1, window_bounds = array<i64: 32, 32>}, {pipeline_mode = #tpu.pipeline_mode<synchronous>, transform_indices = @transform_2, window_bounds = array<i64: 1, 32>}, {pipeline_mode = #tpu.pipeline_mode<synchronous>, transform_indices = @transform_3, window_bounds = array<i64: 32, 16>}, {pipeline_mode = #tpu.pipeline_mode<synchronous>, transform_indices = @transform_4, window_bounds = array<i64: 1, 16>}, {transform_indices = @transform_5, window_bounds = array<i64: 16, 16>}]} {
    %c0 = arith.constant 0 : index
    %c0_0 = arith.constant 0 : index
    %0 = vector.load %arg1[%c0, %c0_0] : memref<16x32xf32, #tpu.memory_space<vmem>>, vector<16x32xf32>
    %1 = arith.truncf %0 : vector<16x32xf32> to vector<16x32xbf16>
    %c0_1 = arith.constant 0 : index
    %c0_2 = arith.constant 0 : index
    %2 = vector.load %arg2[%c0_1, %c0_2] : memref<32x32xbf16, #tpu.memory_space<vmem>>, vector<32x32xbf16>
    %cst = arith.constant dense<0.000000e+00> : vector<16x32xf32>
    %3 = tpu.matmul %1, %2, %cst {dimension_numbers = #tpu.dot_dimension_numbers<[1], [0], [0], [1], [0, 0, 1, 1], [], []>} : vector<16x32xbf16>, vector<32x32xbf16>, vector<16x32xf32> -> vector<16x32xf32>
    %c0_3 = arith.constant 0 : index
    %c0_4 = arith.constant 0 : index
    %4 = vector.load %arg3[%c0_3, %c0_4] : memref<1x32xf32, #tpu.memory_space<vmem>>, vector<1x32xf32>
    %5 = vector.broadcast %4 : vector<1x32xf32> to vector<16x32xf32>
    %6 = arith.addf %3, %5 : vector<16x32xf32>
    %cst_5 = arith.constant 0.000000e+00 : f32
    %7 = vector.broadcast %cst_5 : f32 to vector<16x32xf32>
    %8 = arith.maximumf %6, %7 : vector<16x32xf32>
    %9 = arith.truncf %8 : vector<16x32xf32> to vector<16x32xbf16>
    %c0_6 = arith.constant 0 : index
    %c0_7 = arith.constant 0 : index
    %10 = vector.load %arg4[%c0_6, %c0_7] : memref<32x16xbf16, #tpu.memory_space<vmem>>, vector<32x16xbf16>
    %cst_8 = arith.constant dense<0.000000e+00> : vector<16x16xf32>
    %11 = tpu.matmul %9, %10, %cst_8 {dimension_numbers = #tpu.dot_dimension_numbers<[1], [0], [0], [1], [0, 0, 1, 1], [], []>} : vector<16x32xbf16>, vector<32x16xbf16>, vector<16x16xf32> -> vector<16x16xf32>
    %c0_9 = arith.constant 0 : index
    %c0_10 = arith.constant 0 : index
    %12 = vector.load %arg5[%c0_9, %c0_10] : memref<1x16xf32, #tpu.memory_space<vmem>>, vector<1x16xf32>
    %13 = vector.broadcast %12 : vector<1x16xf32> to vector<16x16xf32>
    %14 = arith.addf %11, %13 : vector<16x16xf32>
    %cst_11 = arith.constant dense<0xFF800000> : vector<16xf32>
    %15 = vector.multi_reduction <maximumf>, %14, %cst_11 [1] : vector<16x16xf32> to vector<16xf32>
    %16 = vector.shape_cast %15 : vector<16xf32> to vector<16x1xf32>
    %17 = vector.broadcast %16 : vector<16x1xf32> to vector<16x16xf32>
    %18 = arith.subf %14, %17 : vector<16x16xf32>
    %19 = math.exp %18 : vector<16x16xf32>
    %cst_12 = arith.constant dense<0.000000e+00> : vector<16xf32>
    %20 = vector.multi_reduction <add>, %19, %cst_12 [1] : vector<16x16xf32> to vector<16xf32>
    %21 = vector.shape_cast %20 : vector<16xf32> to vector<16x1xf32>
    %22 = tpu.reciprocal %21 : vector<16x1xf32> -> vector<16x1xf32>
    %23 = vector.broadcast %22 : vector<16x1xf32> to vector<16x16xf32>
    %24 = arith.mulf %19, %23 : vector<16x16xf32>
    %c0_13 = arith.constant 0 : index
    %c0_14 = arith.constant 0 : index
    %25 = vector.load %arg6[%c0_13, %c0_14] : memref<16x16xf32, #tpu.memory_space<vmem>>, vector<16x16xf32>
    tpu.vector_store %arg6[%c0_13, %c0_14], %24 {strides = array<i32>} : memref<16x16xf32, #tpu.memory_space<vmem>>, vector<16x16xf32>,
    return
  }
  func.func @transform_0(%arg0: i32) -> (i32, i32) {
    %c0_i32 = arith.constant 0 : i32
    %c0_i32_0 = arith.constant 0 : i32
    return %arg0, %c0_i32 : i32, i32
  }
  func.func @transform_1(%arg0: i32) -> (i32, i32) {
    %c0_i32 = arith.constant 0 : i32
    %c0_i32_0 = arith.constant 0 : i32
    %c0_i32_1 = arith.constant 0 : i32
    return %c0_i32, %c0_i32_0 : i32, i32
  }
  func.func @transform_2(%arg0: i32) -> (i32, i32) {
    %c0_i32 = arith.constant 0 : i32
    %c0_i32_0 = arith.constant 0 : i32
    %c0_i32_1 = arith.constant 0 : i32
    return %c0_i32, %c0_i32_0 : i32, i32
  }
  func.func @transform_3(%arg0: i32) -> (i32, i32) {
    %c0_i32 = arith.constant 0 : i32
    %c0_i32_0 = arith.constant 0 : i32
    %c0_i32_1 = arith.constant 0 : i32
    return %c0_i32, %c0_i32_0 : i32, i32
  }
  func.func @transform_4(%arg0: i32) -> (i32, i32) {
    %c0_i32 = arith.constant 0 : i32
    %c0_i32_0 = arith.constant 0 : i32
    %c0_i32_1 = arith.constant 0 : i32
    return %c0_i32, %c0_i32_0 : i32, i32
  }
  func.func @transform_5(%arg0: i32) -> (i32, i32) {
    %c0_i32 = arith.constant 0 : i32
    %c0_i32_0 = arith.constant 0 : i32
    return %arg0, %c0_i32 : i32, i32
  }
}

module attributes {stable_mosaic.version = 11 : i64} {
  func.func @_relation_network_kernel(%arg0: i32, %arg1: memref<16x32xf32, #tpu.memory_space<vmem>>, %arg2: memref<32x32xbf16, #tpu.memory_space<vmem>>, %arg3: memref<1x32xf32, #tpu.memory_space<vmem>>, %arg4: memref<32x16xbf16, #tpu.memory_space<vmem>>, %arg5: memref<1x16xf32, #tpu.memory_space<vmem>>, %arg6: memref<16x16xf32, #tpu.memory_space<vmem>>) attributes {dimension_semantics = [#tpu.dimension_semantics<parallel>], iteration_bounds = array<i64: 2>, scalar_prefetch = 0 : i64, scratch_operands = 0 : i64, tpu.core_type = #tpu.core_type<tc>, window_params = [{transform_indices = @transform_0, window_bounds = array<i64: 16, 32>}, {pipeline_mode = #tpu.pipeline_mode<synchronous>, transform_indices = @transform_1, window_bounds = array<i64: 32, 32>}, {pipeline_mode = #tpu.pipeline_mode<synchronous>, transform_indices = @transform_2, window_bounds = array<i64: 1, 32>}, {pipeline_mode = #tpu.pipeline_mode<synchronous>, transform_indices = @transform_3, window_bounds = array<i64: 32, 16>}, {pipeline_mode = #tpu.pipeline_mode<synchronous>, transform_indices = @transform_4, window_bounds = array<i64: 1, 16>}, {transform_indices = @transform_5, window_bounds = array<i64: 16, 16>}]} {
    %c0 = arith.constant 0 : index
    %c0_0 = arith.constant 0 : index
    %0 = vector.load %arg1[%c0, %c0_0] : memref<16x32xf32, #tpu.memory_space<vmem>>, vector<16x32xf32>
    %1 = arith.truncf %0 : vector<16x32xf32> to vector<16x32xbf16>
    %c0_1 = arith.constant 0 : index
    %c0_2 = arith.constant 0 : index
    %2 = vector.load %arg2[%c0_1, %c0_2] : memref<32x32xbf16, #tpu.memory_space<vmem>>, vector<32x32xbf16>
    %cst = arith.constant dense<0.000000e+00> : vector<16x32xf32>
    %3 = tpu.matmul %1, %2, %cst {dimension_numbers = #tpu.dot_dimension_numbers<[1], [0], [0], [1], [0, 0, 1, 1], [], []>} : vector<16x32xbf16>, vector<32x32xbf16>, vector<16x32xf32> -> vector<16x32xf32>
    %c0_3 = arith.constant 0 : index
    %c0_4 = arith.constant 0 : index
    %4 = vector.load %arg3[%c0_3, %c0_4] : memref<1x32xf32, #tpu.memory_space<vmem>>, vector<1x32xf32>
    %5 = vector.broadcast %4 : vector<1x32xf32> to vector<16x32xf32>
    %6 = arith.addf %3, %5 : vector<16x32xf32>
    %cst_5 = arith.constant 0.000000e+00 : f32
    %7 = vector.broadcast %cst_5 : f32 to vector<16x32xf32>
    %8 = arith.maximumf %6, %7 : vector<16x32xf32>
    %9 = arith.truncf %8 : vector<16x32xf32> to vector<16x32xbf16>
    %c0_6 = arith.constant 0 : index
    %c0_7 = arith.constant 0 : index
    %10 = vector.load %arg4[%c0_6, %c0_7] : memref<32x16xbf16, #tpu.memory_space<vmem>>, vector<32x16xbf16>
    %cst_8 = arith.constant dense<0.000000e+00> : vector<16x16xf32>
    %11 = tpu.matmul %9, %10, %cst_8 {dimension_numbers = #tpu.dot_dimension_numbers<[1], [0], [0], [1], [0, 0, 1, 1], [], []>} : vector<16x32xbf16>, vector<32x16xbf16>, vector<16x16xf32> -> vector<16x16xf32>
    %c0_9 = arith.constant 0 : index
    %c0_10 = arith.constant 0 : index
    %12 = vector.load %arg5[%c0_9, %c0_10] : memref<1x16xf32, #tpu.memory_space<vmem>>, vector<1x16xf32>
    %13 = vector.broadcast %12 : vector<1x16xf32> to vector<16x16xf32>
    %14 = arith.addf %11, %13 : vector<16x16xf32>
    %cst_11 = arith.constant dense<0xFF800000> : vector<16xf32>
    %15 = vector.multi_reduction <maximumf>, %14, %cst_11 [1] : vector<16x16xf32> to vector<16xf32>
    %16 = vector.shape_cast %15 : vector<16xf32> to vector<16x1xf32>
    %17 = vector.broadcast %16 : vector<16x1xf32> to vector<16x16xf32>
    %18 = arith.subf %14, %17 : vector<16x16xf32>
    %19 = math.exp %18 : vector<16x16xf32>
    %cst_12 = arith.constant dense<0.000000e+00> : vector<16xf32>
    %20 = vector.multi_reduction <add>, %19, %cst_12 [1] : vector<16x16xf32> to vector<16xf32>
    %21 = vector.shape_cast %20 : vector<16xf32> to vector<16x1xf32>
    %22 = tpu.reciprocal %21 : vector<16x1xf32> -> vector<16x1xf32>
    %23 = vector.broadcast %22 : vector<16x1xf32> to vector<16x16xf32>
    %24 = arith.mulf %19, %23 : vector<16x16xf32>
    %c0_13 = arith.constant 0 : index
    %c0_14 = arith.constant 0 : index
    %25 = vector.load %arg6[%c0_13, %c0_14] : memref<16x16xf32, #tpu.memory_space<vmem>>, vector<16x16xf32>
    tpu.vector_store %arg6[%c0_13, %c0_14], %24 {strides = array<i32>} : memref<16x16xf32, #tpu.memory_space<vmem>>, vector<16x16xf32>,
    return
  }
  func.func @transform_0(%arg0: i32) -> (i32, i32) {
    %c0_i32 = arith.constant 0 : i32
    %c0_i32_0 = arith.constant 0 : i32
    return %arg0, %c0_i32 : i32, i32
  }
  func.func @transform_1(%arg0: i32) -> (i32, i32) {
    %c0_i32 = arith.constant 0 : i32
    %c0_i32_0 = arith.constant 0 : i32
    %c0_i32_1 = arith.constant 0 : i32
    return %c0_i32, %c0_i32_0 : i32, i32
  }
  func.func @transform_2(%arg0: i32) -> (i32, i32) {
    %c0_i32 = arith.constant 0 : i32
    %c0_i32_0 = arith.constant 0 : i32
    %c0_i32_1 = arith.constant 0 : i32
    return %c0_i32, %c0_i32_0 : i32, i32
  }
  func.func @transform_3(%arg0: i32) -> (i32, i32) {
    %c0_i32 = arith.constant 0 : i32
    %c0_i32_0 = arith.constant 0 : i32
    %c0_i32_1 = arith.constant 0 : i32
    return %c0_i32, %c0_i32_0 : i32, i32
  }
  func.func @transform_4(%arg0: i32) -> (i32, i32) {
    %c0_i32 = arith.constant 0 : i32
    %c0_i32_0 = arith.constant 0 : i32
    %c0_i32_1 = arith.constant 0 : i32
    return %c0_i32, %c0_i32_0 : i32, i32
  }
  func.func @transform_5(%arg0: i32) -> (i32, i32) {
    %c0_i32 = arith.constant 0 : i32
    %c0_i32_0 = arith.constant 0 : i32
    return %arg0, %c0_i32 : i32, i32
  }
}

</mosaic_0001>

<bundles_post_ra>
// kernel: tpu_custom_call.1
= control target key start
LH: loop header
LB: loop body
LE: loop exit
PB: predicated region body
PF: predicated region fallthrough
CT: control target
= control target key end

     0   :  { %10 = vsyncpa [#allocation3], 0  ;;  %s749_s0 = inlined_call_operand.hbm [shape: f32[32,32], index: 0, kind: input, shape index: {}]   ;;  %s750_s1 = inlined_call_operand.vmem [shape: bf16[32,32], index: 1, kind: input, shape index: {}]   ;;  %s751_s2 = inlined_call_operand.vmem [shape: f32[1,32], index: 2, kind: input, shape index: {}]   ;;  %s752_s3 = inlined_call_operand.vmem [shape: bf16[32,16], index: 3, kind: input, shape index: {}]   ;;  %s753_s4 = inlined_call_operand.vmem [shape: f32[1,16], index: 4, kind: input, shape index: {}]   ;;  %s754_s5 = inlined_call_operand.vmem [shape: f32[32,16], index: 5, kind: output, shape index: {}]  }
   0x1   :  { %12 = vsyncpa [#allocation3 + $0x1], 0  ;;  %s634_s18 = smov 0   ;;  %s636_s19 = smov 0  }
   0x2   :  { %s638_s20 = smov 0   ;;  %s640_s21 = smov 0  }
   0x3 LB: > { %s449_s22 = sadd.s32 4294967295, %s600_s21   ;;  %s654_s23 = sadd.s32 1, %s600_s21   ;;  %s600_s21 = sphi %s640_s21, %s761_s21   ;;  %s596_s20 = sphi %s638_s20, %s760_s20   ;;  %s592_s19 = sphi %s636_s19, %s759_s19   ;;  %s588_s18 = sphi %s634_s18, %s758_s18  }
   0x4   : > { %s22_s24 = ssub.s32 %s600_s21, %s654_s23  ;;  %s25_s25 = sadd.s32 1, %s596_s20 }
   0x5   : > { %p23_p0 = scmp.eq.s32.totalorder %s22_s24, 0  ;;  %p32_p1 = scmp.ne.s32.totalorder %s596_s20, %s592_s19 }
   0x6   : > { %p33_p2 = scmp.eq.s32.totalorder %s600_s21, 0  ;;  %p38_p3 = scmp.ne.s32.totalorder %s592_s19, %s588_s18 }
   0x7   : > { %s664_s26 = scalar_select %p23_p0, %s596_s20, %s25_s25  }
   0x8   : > { %p666_p4 = por %p33_p2, %p32_p1  ;;  %p39_p5 = scmp.eq.s32.totalorder %s449_s22, 0 }
   0x9   : > { %p491_p6 = scmp.lt.s32.totalorder %s600_s21, 2  ;;  %s184_s29 = sand.u32 1, %s596_s20  }
   0xa   : > { %p673_p7 = por %p39_p5, %p38_p3  ;;  %s453_s30 = sshll.u32 %s184_s29, 4 }
   0xb   : > { %s480_s6 = sshll.u32 %s600_s21, 4  ;;  %s188_s10 = scalar_lea.vmem [#allocation2], %s453_s30 }
   0xc   : > { %s193_s9 = scalar_lea.hbm %s749_s0, %s480_s6  ;;  %s196_s11 = sshll.u32 %s188_s10, 4  ;;  %s197_s11 = int_to_ptr.vmem [resolvable:$true] %s196_s11 }
   0xd   : > { %s194_s12 = sshll.u32 %s193_s9, 4  ;;  %p684_p8 = pnand %p491_p6, %p666_p4  ;;  %s195_s12 = int_to_ptr.hbm [resolvable:$true] %s194_s12 }
   0xe   : > { %p456_p9 = scmp.ge.s32.totalorder %s600_s21, 1  ;;  %s185_s14 = scalar_lea.sflag [#allocation3], %s184_s29 }
   0xf   : > { %s536_s15 = sshra.s32 %s195_s12, 4  ;;  %p540_p11 = pneg %p684_p8  ;;  %s537_s15 = int_to_ptr.hbm [resolvable:$true] %s536_s15 }
  0x10   : > { %s538_s16 = scalar_lea.hbm %s537_s15, 16  ;;  %s543_s24 = scalar_lea.hbm %s749_s0, 32 }
  0x11   : > { %p539_p10 = scmp.ne.s32.totalorder %s537_s15, %s538_s16  ;;  %p544_p0 = scmp.lt.s32.totalorder %s537_s15, %s749_s0 }
  0x12   : > { %p545_p1 = scmp.lt.s32.totalorder %s543_s24, %s538_s16 }
  0x13   : > { %p541_p12 = pnand %p540_p11, %p539_p10 }
  0x14   : > { %p546_p2 = por %p545_p1, %p544_p0 }
  0x15   : > { %p542_p13 = pneg %p541_p12 }
  0x17   : > { %p547_p3 = pnand %p546_p2, %p542_p13 }
  0x19   : > { %550 = shalt.err (!%p547_p3)
}
  0x1a   : > { %s602_s29 = smov 128   ;;  %s603_s30 = smov 8  }
  0x1b   : > { %490 = dma.hbm_to_vmem [thread:$0]  (!%p684_p8), %s195_s12, 256, %s197_s11, %s185_s14, %s602_s29, %s602_s29, %s603_s30  }
  0x1c   : > { %p204_p4 = scmp.lt.s32.totalorder %s600_s21, 3 }
  0x1e   : > { %p205_p5 = pnand %p456_p9, %p204_p4 }
  0x1f   : > { %s210_s6 = sand.u32 (!%p205_p5), 1, %s592_s19  }
  0x20   : > { %208 = sbr.rel (%p205_p5) target bundleno = 587 (0x24b), region = 40  ;;  %s457_s7 = sshll.u32 (!%p205_p5), %s210_s6, 4 }
  0x21   : > { %s211_s8 = scalar_lea.sflag (!%p205_p5), [#allocation3], %s210_s6  ;;  %s214_s9 = scalar_lea.vmem (!%p205_p5), [#allocation2], %s457_s7 }
  0x25   : > { %583 = dma.done.wait (%p673_p7), %s211_s8, 256  }
  0x26   : > { %585 = vsyncadd (%p673_p7), %s211_s8, 4294967040  ;;  %v482_v0 = vld [vmem:[%s750_s1 + $0x8] sm:$0xff]  ;;  %v481_v1 = vld [vmem:[%s750_s1] sm:$0xff]  ;;  %vm273_vm0 = vcmask 261120   ;;  %vm331_vm1 = vcmask 130048   ;;  %s458_s27 = sshll.u32 %s449_s22, 1 }
  0x27   : > { %283 = vmatpush.bf16.msra.mxu0 %v482_v0  ;;  %v250_v2 = vld [vmem:[%s214_s9] sm:$0xff]  ;;  %v251_v3 = vld [vmem:[%s214_s9 + $0x8] sm:$0xff]  ;;  %p244_p6 = scmp.lt.s32.totalorder %s458_s27, 3 }
  0x28   : > { %v252_v4 = vpack.c.bf16 %v251_v3, %v250_v2  ;;  %v484_v5 = vld [vmem:[%s752_s3 + $0x8] sm:$0xff]  ;;  %v483_v6 = vld [vmem:[%s752_s3] sm:$0xff] }
  0x29   : > { %323 = vmatpush.bf16.msra.mxu1 %v484_v5  ;;  %v526_v8 = vld [vmem:[%s751_s2] ss:$0 sm:$0xff]  ;;  %s763_s27 = smov (!%p244_p6, %s458_s27), 3 }
  0x2a   : > { %v527_v15 = vld [vmem:[%s753_s4] ss:$0 sm:$0xff]  ;;  %s459_s29 = sshll.u32 %s763_s27, 3 }
  0x2b   : > { %284 = vmatpush.bf16.msra.mxu0 %v481_v1  ;;  %s247_s30 = scalar_lea.vmem %s754_s5, %s459_s29 }
  0x2d   : > { %324 = vmatpush.bf16.msra.mxu1 %v483_v6 }
  0x2e   : > { %468 = vmatmul.msk.bf16.vlgmr.msra.gmra.mxu0 %vm273_vm0, %v252_v4 }
  0xab   : > { %v286_v7 = vpop.f32.mrf.mxu0 }
  0xac   : > { %v287_v9 = vadd.f32 %v526_v8, %v286_v7 }
  0xae   : > { %v291_v12 = vmax.f32 %v287_v9, 0.0 }
  0xb3   : > { %v288_v10 = vpop.f32.mrf.mxu0 }
  0xb4   : > { %v289_v11 = vadd.f32 %v526_v8, %v288_v10 }
  0xb6   : > { %v292_v13 = vmax.f32 %v289_v11, 0.0 }
  0xb8   : > { %v293_v14 = vpack.c.bf16 %v292_v13, %v291_v12 }
  0xba   : > { %477 = vmatmul.msk.bf16.vlgmr.msra.gmra.mxu1 %vm273_vm0, %v293_v14 }
 0x137   : > { %v326_v16 = vpop.f32.mrf.mxu1 }
 0x138   : > { %v327_v17 = vadd.f32 %v527_v15, %v326_v16 }
 0x13a   : > { %v332_v18 = vsel %vm331_vm1, %v327_v17, -inf }
 0x13b   : > { %333 = vmax.xlane.f32.xlu0 %v332_v18 }
 0x13f   : > { %v328_v19 = vpop.f32.mrf.mxu1 }
 0x140   : > { %v329_v20 = vadd.f32 %v527_v15, %v328_v19 }
 0x142   : > { %v335_v21 = vsel %vm331_vm1, %v329_v20, -inf }
 0x143   : > { %336 = vmax.xlane.f32.xlu0 %v335_v21 }
 0x1ae   : > { %v334_v22 = vpop.xlane.xlu0 %333 }
 0x1af   : > { %v338_v23 = vsub.f32 %v327_v17, %v334_v22 }
 0x1b1   : > { %v340_v24 = vmul.f32 1.442695, %v338_v23 }
 0x1b3   : > { %528 = vpow2.f32 %v340_v24 }
 0x1b6   : > { %v337_v25 = vpop.xlane.xlu0 %336 }
 0x1b7   : > { %v339_v26 = vsub.f32 %v329_v20, %v337_v25 }
 0x1b9   : > { %v529_v27 = vpop.eup %528  ;;  %v342_v28 = vmul.f32 1.442695, %v339_v26 }
 0x1ba   : > { %v344_v29 = vsel %vm331_vm1, %v529_v27, 0.0 }
 0x1bb   : > { %530 = vpow2.f32 %v342_v28  ;;  %345 = vadd.xlane.f32.xlu1 %v344_v29 }
 0x1c1   : > { %v531_v30 = vpop.eup %530 }
 0x1c2   : > { %v347_v31 = vsel %vm331_vm1, %v531_v30, 0.0 }
 0x1c3   : > { %348 = vadd.xlane.f32.xlu1 %v347_v31 }
 0x22e   : > { %v346_v32 = vpop.xlane.xlu1 %345 }
 0x22f   : > { %532 = vrcp.f32 %v346_v32  ;;  %v361_v37 = vand.u32 2147483648, %v346_v32  ;;  %v359_v39 = vand.u32 2147483647, %v346_v32  ;;  %vm355_vm3 = vweird.f32 %v346_v32 }
 0x231   : > { %v362_v42 = vor.u32 1.1754944e-38, %v361_v37  ;;  %vm360_vm5 = vcmp.eq.f32.partialorder %v359_v39, 8.507059e+37 }
 0x235   : > { %v533_v33 = vpop.eup %532 }
 0x236   : > { %v351_v34 = vmul.f32 %v533_v33, %v346_v32  ;;  %v349_v35 = vpop.xlane.xlu1 %348  ;;  %vm356_vm2 = vweird.f32 %v533_v33 }
 0x237   : > { %534 = vrcp.f32 %v349_v35  ;;  %vm357_vm4 = vmor %vm355_vm3, %vm356_vm2  ;;  %v375_v48 = vand.u32 2147483648, %v349_v35  ;;  %v373_v50 = vand.u32 2147483647, %v349_v35  ;;  %vm369_vm7 = vweird.f32 %v349_v35 }
 0x238   : > { %v352_v36 = vsub.f32 1.0, %v351_v34 }
 0x239   : > { %v376_v52 = vor.u32 1.1754944e-38, %v375_v48  ;;  %vm374_vm9 = vcmp.eq.f32.partialorder %v373_v50, 8.507059e+37 }
 0x23a   : > { %v353_v38 = vmul.f32 %v533_v33, %v352_v36 }
 0x23c   : > { %v354_v40 = vadd.f32 %v533_v33, %v353_v38 }
 0x23d   : > { %v535_v41 = vpop.eup %534 }
 0x23e   : > { %v358_v43 = vsel %vm357_vm4, %v533_v33, %v354_v40  ;;  %v365_v44 = vmul.f32 %v535_v41, %v349_v35  ;;  %vm370_vm6 = vweird.f32 %v535_v41 }
 0x23f   : > { %v363_v45 = vsel %vm360_vm5, %v362_v42, %v358_v43  ;;  %vm371_vm8 = vmor %vm369_vm7, %vm370_vm6 }
 0x240   : > { %v378_v46 = vmul.f32 %v529_v27, %v363_v45  ;;  %v366_v47 = vsub.f32 1.0, %v365_v44 }
 0x242   : > { %380 = vst.msk [vmem:[%s247_s30] sm:$0xff] %vm331_vm1, %v378_v46  ;;  %v367_v49 = vmul.f32 %v535_v41, %v366_v47 }
 0x244   : > { %v368_v51 = vadd.f32 %v535_v41, %v367_v49 }
 0x246   : > { %v372_v53 = vsel %vm371_vm8, %v535_v41, %v368_v51 }
 0x247   : > { %v377_v54 = vsel %vm374_vm9, %v376_v52, %v372_v53 }
 0x248   : > { %v379_v55 = vmul.f32 %v531_v30, %v377_v54 }
 0x24a   : > { %381 = vst.msk [vmem:[%s247_s30 + $0x8] sm:$0xff] %vm331_vm1, %v379_v55 }
 0x24b PF: > { %p15_p7 = scmp.ge.s32.totalorder %s654_s23, 4   ;;  %s758_s18 = smov %s592_s19 }
 0x24c   : > { %s759_s19 = smov %s596_s20  ;;  %s760_s20 = smov %s664_s26 }
 0x24d   : > { %s761_s21 = smov %s654_s23  ;;  %17 = sbr.rel (!%p15_p7) target bundleno = 3 (0x3), region = 80 }
 0x252   :  { %404 = vsyncpa [#allocation3], 1 }
 0x253   :  { %406 = vsyncpa [#allocation3 + $0x1], 1 }

// kernel: tpu_custom_call.1
= control target key start
LH: loop header
LB: loop body
LE: loop exit
PB: predicated region body
PF: predicated region fallthrough
CT: control target
= control target key end

     0   :  { %10 = vsyncpa [#allocation3], 0  ;;  %s749_s0 = inlined_call_operand.hbm [shape: f32[32,32], index: 0, kind: input, shape index: {}]   ;;  %s750_s1 = inlined_call_operand.vmem [shape: bf16[32,32], index: 1, kind: input, shape index: {}]   ;;  %s751_s2 = inlined_call_operand.vmem [shape: f32[1,32], index: 2, kind: input, shape index: {}]   ;;  %s752_s3 = inlined_call_operand.vmem [shape: bf16[32,16], index: 3, kind: input, shape index: {}]   ;;  %s753_s4 = inlined_call_operand.vmem [shape: f32[1,16], index: 4, kind: input, shape index: {}]   ;;  %s754_s5 = inlined_call_operand.vmem [shape: f32[32,16], index: 5, kind: output, shape index: {}]  }
   0x1   :  { %12 = vsyncpa [#allocation3 + $0x1], 0  ;;  %s634_s18 = smov 0   ;;  %s636_s19 = smov 0  }
   0x2   :  { %s638_s20 = smov 0   ;;  %s640_s21 = smov 0  }
   0x3 LB: > { %s449_s22 = sadd.s32 4294967295, %s600_s21   ;;  %s654_s23 = sadd.s32 1, %s600_s21   ;;  %s600_s21 = sphi %s640_s21, %s761_s21   ;;  %s596_s20 = sphi %s638_s20, %s760_s20   ;;  %s592_s19 = sphi %s636_s19, %s759_s19   ;;  %s588_s18 = sphi %s634_s18, %s758_s18  }
   0x4   : > { %s22_s24 = ssub.s32 %s600_s21, %s654_s23  ;;  %s25_s25 = sadd.s32 1, %s596_s20 }
   0x5   : > { %p23_p0 = scmp.eq.s32.totalorder %s22_s24, 0  ;;  %p32_p1 = scmp.ne.s32.totalorder %s596_s20, %s592_s19 }
   0x6   : > { %p33_p2 = scmp.eq.s32.totalorder %s600_s21, 0  ;;  %p38_p3 = scmp.ne.s32.totalorder %s592_s19, %s588_s18 }
   0x7   : > { %s664_s26 = scalar_select %p23_p0, %s596_s20, %s25_s25  }
   0x8   : > { %p666_p4 = por %p33_p2, %p32_p1  ;;  %p39_p5 = scmp.eq.s32.totalorder %s449_s22, 0 }
   0x9   : > { %p491_p6 = scmp.lt.s32.totalorder %s600_s21, 2  ;;  %s184_s29 = sand.u32 1, %s596_s20  }
   0xa   : > { %p673_p7 = por %p39_p5, %p38_p3  ;;  %s453_s30 = sshll.u32 %s184_s29, 4 }
   0xb   : > { %s480_s6 = sshll.u32 %s600_s21, 4  ;;  %s188_s10 = scalar_lea.vmem [#allocation2], %s453_s30 }
   0xc   : > { %s193_s9 = scalar_lea.hbm %s749_s0, %s480_s6  ;;  %s196_s11 = sshll.u32 %s188_s10, 4  ;;  %s197_s11 = int_to_ptr.vmem [resolvable:$true] %s196_s11 }
   0xd   : > { %s194_s12 = sshll.u32 %s193_s9, 4  ;;  %p684_p8 = pnand %p491_p6, %p666_p4  ;;  %s195_s12 = int_to_ptr.hbm [resolvable:$true] %s194_s12 }
   0xe   : > { %p456_p9 = scmp.ge.s32.totalorder %s600_s21, 1  ;;  %s185_s14 = scalar_lea.sflag [#allocation3], %s184_s29 }
   0xf   : > { %s536_s15 = sshra.s32 %s195_s12, 4  ;;  %p540_p11 = pneg %p684_p8  ;;  %s537_s15 = int_to_ptr.hbm [resolvable:$true] %s536_s15 }
  0x10   : > { %s538_s16 = scalar_lea.hbm %s537_s15, 16  ;;  %s543_s24 = scalar_lea.hbm %s749_s0, 32 }
  0x11   : > { %p539_p10 = scmp.ne.s32.totalorder %s537_s15, %s538_s16  ;;  %p544_p0 = scmp.lt.s32.totalorder %s537_s15, %s749_s0 }
  0x12   : > { %p545_p1 = scmp.lt.s32.totalorder %s543_s24, %s538_s16 }
  0x13   : > { %p541_p12 = pnand %p540_p11, %p539_p10 }
  0x14   : > { %p546_p2 = por %p545_p1, %p544_p0 }
  0x15   : > { %p542_p13 = pneg %p541_p12 }
  0x17   : > { %p547_p3 = pnand %p546_p2, %p542_p13 }
  0x19   : > { %550 = shalt.err (!%p547_p3)
}
  0x1a   : > { %s602_s29 = smov 128   ;;  %s603_s30 = smov 8  }
  0x1b   : > { %490 = dma.hbm_to_vmem [thread:$0]  (!%p684_p8), %s195_s12, 256, %s197_s11, %s185_s14, %s602_s29, %s602_s29, %s603_s30  }
  0x1c   : > { %p204_p4 = scmp.lt.s32.totalorder %s600_s21, 3 }
  0x1e   : > { %p205_p5 = pnand %p456_p9, %p204_p4 }
  0x1f   : > { %s210_s6 = sand.u32 (!%p205_p5), 1, %s592_s19  }
  0x20   : > { %208 = sbr.rel (%p205_p5) target bundleno = 587 (0x24b), region = 40  ;;  %s457_s7 = sshll.u32 (!%p205_p5), %s210_s6, 4 }
  0x21   : > { %s211_s8 = scalar_lea.sflag (!%p205_p5), [#allocation3], %s210_s6  ;;  %s214_s9 = scalar_lea.vmem (!%p205_p5), [#allocation2], %s457_s7 }
  0x25   : > { %583 = dma.done.wait (%p673_p7), %s211_s8, 256  }
  0x26   : > { %585 = vsyncadd (%p673_p7), %s211_s8, 4294967040  ;;  %v482_v0 = vld [vmem:[%s750_s1 + $0x8] sm:$0xff]  ;;  %v481_v1 = vld [vmem:[%s750_s1] sm:$0xff]  ;;  %vm273_vm0 = vcmask 261120   ;;  %vm331_vm1 = vcmask 130048   ;;  %s458_s27 = sshll.u32 %s449_s22, 1 }
  0x27   : > { %283 = vmatpush.bf16.msra.mxu0 %v482_v0  ;;  %v250_v2 = vld [vmem:[%s214_s9] sm:$0xff]  ;;  %v251_v3 = vld [vmem:[%s214_s9 + $0x8] sm:$0xff]  ;;  %p244_p6 = scmp.lt.s32.totalorder %s458_s27, 3 }
  0x28   : > { %v252_v4 = vpack.c.bf16 %v251_v3, %v250_v2  ;;  %v484_v5 = vld [vmem:[%s752_s3 + $0x8] sm:$0xff]  ;;  %v483_v6 = vld [vmem:[%s752_s3] sm:$0xff] }
  0x29   : > { %323 = vmatpush.bf16.msra.mxu1 %v484_v5  ;;  %v526_v8 = vld [vmem:[%s751_s2] ss:$0 sm:$0xff]  ;;  %s763_s27 = smov (!%p244_p6, %s458_s27), 3 }
  0x2a   : > { %v527_v15 = vld [vmem:[%s753_s4] ss:$0 sm:$0xff]  ;;  %s459_s29 = sshll.u32 %s763_s27, 3 }
  0x2b   : > { %284 = vmatpush.bf16.msra.mxu0 %v481_v1  ;;  %s247_s30 = scalar_lea.vmem %s754_s5, %s459_s29 }
  0x2d   : > { %324 = vmatpush.bf16.msra.mxu1 %v483_v6 }
  0x2e   : > { %468 = vmatmul.msk.bf16.vlgmr.msra.gmra.mxu0 %vm273_vm0, %v252_v4 }
  0xab   : > { %v286_v7 = vpop.f32.mrf.mxu0 }
  0xac   : > { %v287_v9 = vadd.f32 %v526_v8, %v286_v7 }
  0xae   : > { %v291_v12 = vmax.f32 %v287_v9, 0.0 }
  0xb3   : > { %v288_v10 = vpop.f32.mrf.mxu0 }
  0xb4   : > { %v289_v11 = vadd.f32 %v526_v8, %v288_v10 }
  0xb6   : > { %v292_v13 = vmax.f32 %v289_v11, 0.0 }
  0xb8   : > { %v293_v14 = vpack.c.bf16 %v292_v13, %v291_v12 }
  0xba   : > { %477 = vmatmul.msk.bf16.vlgmr.msra.gmra.mxu1 %vm273_vm0, %v293_v14 }
 0x137   : > { %v326_v16 = vpop.f32.mrf.mxu1 }
 0x138   : > { %v327_v17 = vadd.f32 %v527_v15, %v326_v16 }
 0x13a   : > { %v332_v18 = vsel %vm331_vm1, %v327_v17, -inf }
 0x13b   : > { %333 = vmax.xlane.f32.xlu0 %v332_v18 }
 0x13f   : > { %v328_v19 = vpop.f32.mrf.mxu1 }
 0x140   : > { %v329_v20 = vadd.f32 %v527_v15, %v328_v19 }
 0x142   : > { %v335_v21 = vsel %vm331_vm1, %v329_v20, -inf }
 0x143   : > { %336 = vmax.xlane.f32.xlu0 %v335_v21 }
 0x1ae   : > { %v334_v22 = vpop.xlane.xlu0 %333 }
 0x1af   : > { %v338_v23 = vsub.f32 %v327_v17, %v334_v22 }
 0x1b1   : > { %v340_v24 = vmul.f32 1.442695, %v338_v23 }
 0x1b3   : > { %528 = vpow2.f32 %v340_v24 }
 0x1b6   : > { %v337_v25 = vpop.xlane.xlu0 %336 }
 0x1b7   : > { %v339_v26 = vsub.f32 %v329_v20, %v337_v25 }
 0x1b9   : > { %v529_v27 = vpop.eup %528  ;;  %v342_v28 = vmul.f32 1.442695, %v339_v26 }
 0x1ba   : > { %v344_v29 = vsel %vm331_vm1, %v529_v27, 0.0 }
 0x1bb   : > { %530 = vpow2.f32 %v342_v28  ;;  %345 = vadd.xlane.f32.xlu1 %v344_v29 }
 0x1c1   : > { %v531_v30 = vpop.eup %530 }
 0x1c2   : > { %v347_v31 = vsel %vm331_vm1, %v531_v30, 0.0 }
 0x1c3   : > { %348 = vadd.xlane.f32.xlu1 %v347_v31 }
 0x22e   : > { %v346_v32 = vpop.xlane.xlu1 %345 }
 0x22f   : > { %532 = vrcp.f32 %v346_v32  ;;  %v361_v37 = vand.u32 2147483648, %v346_v32  ;;  %v359_v39 = vand.u32 2147483647, %v346_v32  ;;  %vm355_vm3 = vweird.f32 %v346_v32 }
 0x231   : > { %v362_v42 = vor.u32 1.1754944e-38, %v361_v37  ;;  %vm360_vm5 = vcmp.eq.f32.partialorder %v359_v39, 8.507059e+37 }
 0x235   : > { %v533_v33 = vpop.eup %532 }
 0x236   : > { %v351_v34 = vmul.f32 %v533_v33, %v346_v32  ;;  %v349_v35 = vpop.xlane.xlu1 %348  ;;  %vm356_vm2 = vweird.f32 %v533_v33 }
 0x237   : > { %534 = vrcp.f32 %v349_v35  ;;  %vm357_vm4 = vmor %vm355_vm3, %vm356_vm2  ;;  %v375_v48 = vand.u32 2147483648, %v349_v35  ;;  %v373_v50 = vand.u32 2147483647, %v349_v35  ;;  %vm369_vm7 = vweird.f32 %v349_v35 }
 0x238   : > { %v352_v36 = vsub.f32 1.0, %v351_v34 }
 0x239   : > { %v376_v52 = vor.u32 1.1754944e-38, %v375_v48  ;;  %vm374_vm9 = vcmp.eq.f32.partialorder %v373_v50, 8.507059e+37 }
 0x23a   : > { %v353_v38 = vmul.f32 %v533_v33, %v352_v36 }
 0x23c   : > { %v354_v40 = vadd.f32 %v533_v33, %v353_v38 }
 0x23d   : > { %v535_v41 = vpop.eup %534 }
 0x23e   : > { %v358_v43 = vsel %vm357_vm4, %v533_v33, %v354_v40  ;;  %v365_v44 = vmul.f32 %v535_v41, %v349_v35  ;;  %vm370_vm6 = vweird.f32 %v535_v41 }
 0x23f   : > { %v363_v45 = vsel %vm360_vm5, %v362_v42, %v358_v43  ;;  %vm371_vm8 = vmor %vm369_vm7, %vm370_vm6 }
 0x240   : > { %v378_v46 = vmul.f32 %v529_v27, %v363_v45  ;;  %v366_v47 = vsub.f32 1.0, %v365_v44 }
 0x242   : > { %380 = vst.msk [vmem:[%s247_s30] sm:$0xff] %vm331_vm1, %v378_v46  ;;  %v367_v49 = vmul.f32 %v535_v41, %v366_v47 }
 0x244   : > { %v368_v51 = vadd.f32 %v535_v41, %v367_v49 }
 0x246   : > { %v372_v53 = vsel %vm371_vm8, %v535_v41, %v368_v51 }
 0x247   : > { %v377_v54 = vsel %vm374_vm9, %v376_v52, %v372_v53 }
 0x248   : > { %v379_v55 = vmul.f32 %v531_v30, %v377_v54 }
 0x24a   : > { %381 = vst.msk [vmem:[%s247_s30 + $0x8] sm:$0xff] %vm331_vm1, %v379_v55 }
 0x24b PF: > { %p15_p7 = scmp.ge.s32.totalorder %s654_s23, 4   ;;  %s758_s18 = smov %s592_s19 }
 0x24c   : > { %s759_s19 = smov %s596_s20  ;;  %s760_s20 = smov %s664_s26 }
 0x24d   : > { %s761_s21 = smov %s654_s23  ;;  %17 = sbr.rel (!%p15_p7) target bundleno = 3 (0x3), region = 80 }
 0x252   :  { %404 = vsyncpa [#allocation3], 1 }
 0x253   :  { %406 = vsyncpa [#allocation3 + $0x1], 1 }

</bundles_post_ra>
